<compile_context>
chip_gen: v6e
topology: v6e:2x2x1
jax: 0.10.0
libtpu: 0.0.40
codegen_flags: <defaults>
</compile_context>

<pallas_src>
import jax
import jax.numpy as jnp
from jax.experimental import pallas as pl
from jax.experimental.pallas import tpu as pltpu


def _round_up(x, m):
    return -(-x // m) * m


def _vmem_limit_bytes():
    """Scoped-VMEM limit to request: real capacity minus generous headroom."""
    try:
        cap = int(pltpu.get_tpu_info().vmem_capacity_bytes)
    except Exception:
        cap = 64 << 20  # conservative fallback: v7x per-TC capacity
    # ~25% headroom below physical, capped at 96 MiB (v5e/v6e 128 MiB parts).
    return int(min(cap * 3 // 4, 96 << 20))


def _layer_agg_flat_kernel(w_ref, x_ref, o_ref):
    # w_ref: (L,) f32 in SMEM; x_ref: (TB, L*D) in VMEM; o_ref: (TB, D) in VMEM.
    D = o_ref.shape[-1]
    L = x_ref.shape[-1] // D
    # Unrolled scalar-weighted accumulate: per-layer dense lane-slice loads into
    # a single (TB, D) f32 accumulator (pure VPU work).
    acc = w_ref[0] * x_ref[:, :D].astype(jnp.float32)
    for l in range(1, L):
        acc = acc + w_ref[l] * x_ref[:, l * D:(l + 1) * D].astype(jnp.float32)
    o_ref[...] = acc.astype(o_ref.dtype)


def _layer_agg_kernel(w_ref, x_ref, o_ref):
    # w_ref: (L,) f32 in SMEM; x_ref: (TB, L, TD) in VMEM; o_ref: (TB, TD).
    L = x_ref.shape[1]
    acc = w_ref[0] * x_ref[:, 0, :].astype(jnp.float32)
    for l in range(1, L):
        acc = acc + w_ref[l] * x_ref[:, l, :].astype(jnp.float32)
    o_ref[...] = acc.astype(o_ref.dtype)


def layer_aggregator(x, weight):
    """x: (B, L, D), weight: (1, L) -> (B, D)  (== permute -> Linear -> squeeze)."""
    B, L, D = x.shape
    assert weight.shape == (1, L)
    w = weight.reshape(L).astype(jnp.float32)

    itemsize = jnp.dtype(x.dtype).itemsize
    sub = max(8, 32 // itemsize)            # sublane tile: 8 (f32), 16 (bf16)
    vmem_limit = _vmem_limit_bytes()
    budget = vmem_limit - (4 << 20)         # headroom for Mosaic internal scratch

    cost = pl.CostEstimate(
        flops=2 * B * L * D,
        bytes_accessed=itemsize * (B * L * D + B * D) + 4 * L,
        transcendentals=0,
    )
    # >= 2 blocks so both v7x TensorCores get work, a few steps each so the
    # double-buffered pipeline actually overlaps; harmless on single-TC chips.
    MIN_BLOCKS = 4

    # ---------- fast path: D lane-aligned -> flatten to (B, L*D) ------------
    # Per-B-row VMEM cost (x + out, both double-buffered, no sublane padding).
    flat_row_bytes = 2 * (L * D + D) * itemsize
    if D % 128 == 0 and sub * flat_row_bytes <= budget:
        tb_cap = max(sub, (budget // flat_row_bytes) // sub * sub)
        TB = B if B <= tb_cap else tb_cap
        if pl.cdiv(B, TB) < MIN_BLOCKS and B >= 2 * sub:
            target = min(MIN_BLOCKS, B // sub)
            TB = min(TB, _round_up(pl.cdiv(B, target), sub))
        grid = (pl.cdiv(B, TB),)
        return pl.pallas_call(
            _layer_agg_flat_kernel,
            out_shape=jax.ShapeDtypeStruct((B, D), x.dtype),
            grid=grid,
            in_specs=[
                # 12 weights: whole array in SMEM, no per-step DMA.
                pl.BlockSpec(memory_space=pltpu.MemorySpace.SMEM),
                # x tile: (TB, L*D) -> fully contiguous HBM run per step.
                pl.BlockSpec((TB, L * D), lambda i: (i, 0)),
            ],
            out_specs=pl.BlockSpec((TB, D), lambda i: (i, 0)),
            compiler_params=pltpu.CompilerParams(
                dimension_semantics=("parallel",),
                vmem_limit_bytes=vmem_limit,
            ),
            cost_estimate=cost,
        )(w, x.reshape(B, L * D))

    # ---------- fallback path: (TB, L, TD) blocks, L full extent ------------
    Lp = _round_up(L, sub)                  # 12 -> 16 sublane padding of x tile

    def _tile_bytes(tb, td):                # padded, double-buffered x + out
        tdp = _round_up(td, 128)
        return 2 * tb * (Lp * tdp + tdp) * itemsize

    if _tile_bytes(sub, D) <= budget:
        TD = D                              # prefer TD = D (fewer, denser DMAs)
    else:
        td_budget = (budget // (2 * sub * (Lp + 1) * itemsize)) // 128 * 128
        TD = max(128, min(td_budget, (D // 128) * 128))

    tdp = _round_up(TD, 128)
    per_row = 2 * (Lp * tdp + tdp) * itemsize
    tb_cap = max(sub, (budget // per_row) // sub * sub)
    TB = B if B <= tb_cap else tb_cap
    if pl.cdiv(B, TB) * pl.cdiv(D, TD) < MIN_BLOCKS and B >= 2 * sub:
        target = min(MIN_BLOCKS, B // sub)
        TB = min(TB, _round_up(pl.cdiv(B, target), sub))
    grid = (pl.cdiv(B, TB), pl.cdiv(D, TD))

    return pl.pallas_call(
        _layer_agg_kernel,
        out_shape=jax.ShapeDtypeStruct((B, D), x.dtype),
        grid=grid,
        in_specs=[
            pl.BlockSpec(memory_space=pltpu.MemorySpace.SMEM),
            pl.BlockSpec((TB, L, TD), lambda i, j: (i, 0, j)),
        ],
        out_specs=pl.BlockSpec((TB, TD), lambda i, j: (i, j)),
        compiler_params=pltpu.CompilerParams(
            dimension_semantics=("parallel", "parallel"),
            vmem_limit_bytes=vmem_limit,
        ),
        cost_estimate=cost,
    )(w, x)


if __name__ == "__main__":
    NUM_LAYERS = 12

    key = jax.random.PRNGKey(0)
    kw, k1, k2, k3 = jax.random.split(key, 4)

    # nn.Linear(num_layers, 1, bias=False): weight (1, num_layers), PyTorch-style init.
    bound = 1.0 / jnp.sqrt(jnp.float32(NUM_LAYERS))
    weight = jax.random.uniform(
        kw, (1, NUM_LAYERS), dtype=jnp.float32, minval=-bound, maxval=bound
    )

    # 1) Tiny, non-128-aligned D -> (TB, L, TD) fallback path (single block).
    x1 = jax.random.normal(k1, (2, NUM_LAYERS, 16), dtype=jnp.float32)
    out1 = jax.block_until_ready(layer_aggregator(x1, weight))
    ref1 = jnp.einsum("bld,l->bd", x1, weight[0])
    assert out1.shape == (2, 16)
    assert jnp.allclose(out1, ref1, atol=1e-5, rtol=1e-5)

    # 2) 128-aligned D -> flattened (B, L*D) fast path, grid split over B (2 blocks).
    x2 = jax.random.normal(k2, (16, NUM_LAYERS, 256), dtype=jnp.float32)
    out2 = jax.block_until_ready(layer_aggregator(x2, weight))
    ref2 = jnp.einsum("bld,l->bd", x2, weight[0])
    assert out2.shape == (16, 256)
    assert jnp.allclose(out2, ref2, atol=1e-5, rtol=1e-5)

    # 3) bf16 input through the fast path (f32 accumulation, cast back to bf16).
    x3 = jax.random.normal(k3, (8, NUM_LAYERS, 128), dtype=jnp.float32).astype(
        jnp.bfloat16
    )
    out3 = jax.block_until_ready(layer_aggregator(x3, weight))
    ref3 = jnp.einsum("bld,l->bd", x3.astype(jnp.float32), weight[0])
    assert out3.shape == (8, 128)
    assert out3.dtype == jnp.bfloat16
    assert jnp.allclose(out3.astype(jnp.float32), ref3, atol=5e-2, rtol=5e-2)

    print("KERNEL_OK")
</pallas_src>

<mosaic_0001>
module attributes {stable_mosaic.version = 11 : i64} {
  func.func @_layer_agg_kernel(%arg0: i32, %arg1: i32, %arg2: memref<12xf32, #tpu.memory_space<smem>>, %arg3: memref<2x12x16xf32, #tpu.memory_space<vmem>>, %arg4: memref<2x16xf32, #tpu.memory_space<vmem>>) attributes {dimension_semantics = [#tpu.dimension_semantics<parallel>, #tpu.dimension_semantics<parallel>], iteration_bounds = array<i64: 1, 1>, scalar_prefetch = 0 : i64, scratch_operands = 0 : i64, tpu.core_type = #tpu.core_type<tc>, window_params = [{transform_indices = @transform_0, window_bounds = array<i64: 12>}, {transform_indices = @transform_1, window_bounds = array<i64: 2, 12, 16>}, {transform_indices = @transform_2, window_bounds = array<i64: 2, 16>}]} {
    %c0 = arith.constant 0 : index
    %0 = memref.load %arg2[%c0] : memref<12xf32, #tpu.memory_space<smem>>
    %c0_0 = arith.constant 0 : index
    %c0_1 = arith.constant 0 : index
    %c0_2 = arith.constant 0 : index
    %1 = vector.load %arg3[%c0_0, %c0_1, %c0_2] : memref<2x12x16xf32, #tpu.memory_space<vmem>>, vector<2x1x16xf32>
    %2 = vector.shape_cast %1 : vector<2x1x16xf32> to vector<2x16xf32>
    %3 = vector.broadcast %0 : f32 to vector<2x16xf32>
    %4 = arith.mulf %3, %2 : vector<2x16xf32>
    %c1 = arith.constant 1 : index
    %5 = memref.load %arg2[%c1] : memref<12xf32, #tpu.memory_space<smem>>
    %c0_3 = arith.constant 0 : index
    %c1_4 = arith.constant 1 : index
    %c0_5 = arith.constant 0 : index
    %6 = vector.load %arg3[%c0_3, %c1_4, %c0_5] : memref<2x12x16xf32, #tpu.memory_space<vmem>>, vector<2x1x16xf32>
    %7 = vector.shape_cast %6 : vector<2x1x16xf32> to vector<2x16xf32>
    %8 = vector.broadcast %5 : f32 to vector<2x16xf32>
    %9 = arith.mulf %8, %7 : vector<2x16xf32>
    %10 = arith.addf %4, %9 : vector<2x16xf32>
    %c2 = arith.constant 2 : index
    %11 = memref.load %arg2[%c2] : memref<12xf32, #tpu.memory_space<smem>>
    %c0_6 = arith.constant 0 : index
    %c2_7 = arith.constant 2 : index
    %c0_8 = arith.constant 0 : index
    %12 = vector.load %arg3[%c0_6, %c2_7, %c0_8] : memref<2x12x16xf32, #tpu.memory_space<vmem>>, vector<2x1x16xf32>
    %13 = vector.shape_cast %12 : vector<2x1x16xf32> to vector<2x16xf32>
    %14 = vector.broadcast %11 : f32 to vector<2x16xf32>
    %15 = arith.mulf %14, %13 : vector<2x16xf32>
    %16 = arith.addf %10, %15 : vector<2x16xf32>
    %c3 = arith.constant 3 : index
    %17 = memref.load %arg2[%c3] : memref<12xf32, #tpu.memory_space<smem>>
    %c0_9 = arith.constant 0 : index
    %c3_10 = arith.constant 3 : index
    %c0_11 = arith.constant 0 : index
    %18 = vector.load %arg3[%c0_9, %c3_10, %c0_11] : memref<2x12x16xf32, #tpu.memory_space<vmem>>, vector<2x1x16xf32>
    %19 = vector.shape_cast %18 : vector<2x1x16xf32> to vector<2x16xf32>
    %20 = vector.broadcast %17 : f32 to vector<2x16xf32>
    %21 = arith.mulf %20, %19 : vector<2x16xf32>
    %22 = arith.addf %16, %21 : vector<2x16xf32>
    %c4 = arith.constant 4 : index
    %23 = memref.load %arg2[%c4] : memref<12xf32, #tpu.memory_space<smem>>
    %c0_12 = arith.constant 0 : index
    %c4_13 = arith.constant 4 : index
    %c0_14 = arith.constant 0 : index
    %24 = vector.load %arg3[%c0_12, %c4_13, %c0_14] : memref<2x12x16xf32, #tpu.memory_space<vmem>>, vector<2x1x16xf32>
    %25 = vector.shape_cast %24 : vector<2x1x16xf32> to vector<2x16xf32>
    %26 = vector.broadcast %23 : f32 to vector<2x16xf32>
    %27 = arith.mulf %26, %25 : vector<2x16xf32>
    %28 = arith.addf %22, %27 : vector<2x16xf32>
    %c5 = arith.constant 5 : index
    %29 = memref.load %arg2[%c5] : memref<12xf32, #tpu.memory_space<smem>>
    %c0_15 = arith.constant 0 : index
    %c5_16 = arith.constant 5 : index
    %c0_17 = arith.constant 0 : index
    %30 = vector.load %arg3[%c0_15, %c5_16, %c0_17] : memref<2x12x16xf32, #tpu.memory_space<vmem>>, vector<2x1x16xf32>
    %31 = vector.shape_cast %30 : vector<2x1x16xf32> to vector<2x16xf32>
    %32 = vector.broadcast %29 : f32 to vector<2x16xf32>
    %33 = arith.mulf %32, %31 : vector<2x16xf32>
    %34 = arith.addf %28, %33 : vector<2x16xf32>
    %c6 = arith.constant 6 : index
    %35 = memref.load %arg2[%c6] : memref<12xf32, #tpu.memory_space<smem>>
    %c0_18 = arith.constant 0 : index
    %c6_19 = arith.constant 6 : index
    %c0_20 = arith.constant 0 : index
    %36 = vector.load %arg3[%c0_18, %c6_19, %c0_20] : memref<2x12x16xf32, #tpu.memory_space<vmem>>, vector<2x1x16xf32>
    %37 = vector.shape_cast %36 : vector<2x1x16xf32> to vector<2x16xf32>
    %38 = vector.broadcast %35 : f32 to vector<2x16xf32>
    %39 = arith.mulf %38, %37 : vector<2x16xf32>
    %40 = arith.addf %34, %39 : vector<2x16xf32>
    %c7 = arith.constant 7 : index
    %41 = memref.load %arg2[%c7] : memref<12xf32, #tpu.memory_space<smem>>
    %c0_21 = arith.constant 0 : index
    %c7_22 = arith.constant 7 : index
    %c0_23 = arith.constant 0 : index
    %42 = vector.load %arg3[%c0_21, %c7_22, %c0_23] : memref<2x12x16xf32, #tpu.memory_space<vmem>>, vector<2x1x16xf32>
    %43 = vector.shape_cast %42 : vector<2x1x16xf32> to vector<2x16xf32>
    %44 = vector.broadcast %41 : f32 to vector<2x16xf32>
    %45 = arith.mulf %44, %43 : vector<2x16xf32>
    %46 = arith.addf %40, %45 : vector<2x16xf32>
    %c8 = arith.constant 8 : index
    %47 = memref.load %arg2[%c8] : memref<12xf32, #tpu.memory_space<smem>>
    %c0_24 = arith.constant 0 : index
    %c8_25 = arith.constant 8 : index
    %c0_26 = arith.constant 0 : index
    %48 = vector.load %arg3[%c0_24, %c8_25, %c0_26] : memref<2x12x16xf32, #tpu.memory_space<vmem>>, vector<2x1x16xf32>
    %49 = vector.shape_cast %48 : vector<2x1x16xf32> to vector<2x16xf32>
    %50 = vector.broadcast %47 : f32 to vector<2x16xf32>
    %51 = arith.mulf %50, %49 : vector<2x16xf32>
    %52 = arith.addf %46, %51 : vector<2x16xf32>
    %c9 = arith.constant 9 : index
    %53 = memref.load %arg2[%c9] : memref<12xf32, #tpu.memory_space<smem>>
    %c0_27 = arith.constant 0 : index
    %c9_28 = arith.constant 9 : index
    %c0_29 = arith.constant 0 : index
    %54 = vector.load %arg3[%c0_27, %c9_28, %c0_29] : memref<2x12x16xf32, #tpu.memory_space<vmem>>, vector<2x1x16xf32>
    %55 = vector.shape_cast %54 : vector<2x1x16xf32> to vector<2x16xf32>
    %56 = vector.broadcast %53 : f32 to vector<2x16xf32>
    %57 = arith.mulf %56, %55 : vector<2x16xf32>
    %58 = arith.addf %52, %57 : vector<2x16xf32>
    %c10 = arith.constant 10 : index
    %59 = memref.load %arg2[%c10] : memref<12xf32, #tpu.memory_space<smem>>
    %c0_30 = arith.constant 0 : index
    %c10_31 = arith.constant 10 : index
    %c0_32 = arith.constant 0 : index
    %60 = vector.load %arg3[%c0_30, %c10_31, %c0_32] : memref<2x12x16xf32, #tpu.memory_space<vmem>>, vector<2x1x16xf32>
    %61 = vector.shape_cast %60 : vector<2x1x16xf32> to vector<2x16xf32>
    %62 = vector.broadcast %59 : f32 to vector<2x16xf32>
    %63 = arith.mulf %62, %61 : vector<2x16xf32>
    %64 = arith.addf %58, %63 : vector<2x16xf32>
    %c11 = arith.constant 11 : index
    %65 = memref.load %arg2[%c11] : memref<12xf32, #tpu.memory_space<smem>>
    %c0_33 = arith.constant 0 : index
    %c11_34 = arith.constant 11 : index
    %c0_35 = arith.constant 0 : index
    %66 = vector.load %arg3[%c0_33, %c11_34, %c0_35] : memref<2x12x16xf32, #tpu.memory_space<vmem>>, vector<2x1x16xf32>
    %67 = vector.shape_cast %66 : vector<2x1x16xf32> to vector<2x16xf32>
    %68 = vector.broadcast %65 : f32 to vector<2x16xf32>
    %69 = arith.mulf %68, %67 : vector<2x16xf32>
    %70 = arith.addf %64, %69 : vector<2x16xf32>
    %c0_36 = arith.constant 0 : index
    %c0_37 = arith.constant 0 : index
    %71 = vector.load %arg4[%c0_36, %c0_37] : memref<2x16xf32, #tpu.memory_space<vmem>>, vector<2x16xf32>
    tpu.vector_store %arg4[%c0_36, %c0_37], %70 {strides = array<i32>} : memref<2x16xf32, #tpu.memory_space<vmem>>, vector<2x16xf32>,
    return
  }
  func.func @transform_0(%arg0: i32, %arg1: i32) -> i32 {
    %c0_i32 = arith.constant 0 : i32
    %c0_i32_0 = arith.constant 0 : i32
    return %c0_i32 : i32
  }
  func.func @transform_1(%arg0: i32, %arg1: i32) -> (i32, i32, i32) {
    %c0_i32 = arith.constant 0 : i32
    %c0_i32_0 = arith.constant 0 : i32
    return %arg0, %c0_i32, %arg1 : i32, i32, i32
  }
  func.func @transform_2(%arg0: i32, %arg1: i32) -> (i32, i32) {
    %c0_i32 = arith.constant 0 : i32
    return %arg0, %arg1 : i32, i32
  }
}

</mosaic_0001>

<bundles_post_ra>
// kernel: tpu_custom_call.1
= control target key start
LH: loop header
LB: loop body
LE: loop exit
PB: predicated region body
PF: predicated region fallthrough
CT: control target
= control target key end

     0   :  { %7 = vsyncpa [#allocation4], 0  ;;  %s310_s0 = inlined_call_operand.vmem [shape: f32[12], index: 0, kind: input, shape index: {}]   ;;  %s311_s1 = inlined_call_operand.vmem [shape: f32[2,12,16], index: 1, kind: input, shape index: {}]   ;;  %s312_s2 = inlined_call_operand.hbm [shape: f32[2,16], index: 2, kind: output, shape index: {}]  }
   0x1   :  { %8 = vsyncpa [#allocation3], 0  ;;  %s15_s11 = sshll.u32 %s310_s0, 4  ;;  %s16_s11 = int_to_ptr.vmem [resolvable:$true] %s15_s11 }
   0x2   :  { %s155_s12 = scalar_lea.vmem %s16_s11, 16  ;;  %p160_p1 = scmp.lt.s32.totalorder %s16_s11, %s16_s11 }
   0x3   :  { %p156_p0 = scmp.ne.s32.totalorder %s16_s11, %s155_s12  ;;  %p161_p2 = scmp.lt.s32.totalorder %s155_s12, %s155_s12 }
   0x5   :  { %p162_p3 = por %p161_p2, %p160_p1 }
   0x7   :  { %p163_p4 = pnand %p162_p3, %p156_p0 }
   0x9   :  { %166 = shalt.err (!%p163_p4)
}
   0xa   :  { %s191_s13 = smov [#allocation2]  }
   0xb   :  { %18 = dma.vmem_to_smem %s16_s11, 16, %s191_s13, [#allocation4]  }
   0xc   :  { %187 = dma.done.wait [#allocation4], 16  }
   0xd   :  { %188 = vsyncadd [#allocation4], 4294967280 }
   0xe   :  { %24 = sfence }
   0xf   :  { %s25_s14 = sld [smem:[#allocation2]]  ;;  %v26_v0 = vld [vmem:[%s311_s1] sm:$0x1]  ;;  %v27_v1 = vld [vmem:[%s311_s1 + $0x10] sm:$0x1]  ;;  %vm122_vm0 = vcmask 1041409  }
  0x10   :  { %s142_s15 = sld [smem:[#allocation2 + $0x1]]  ;;  %v32_v2 = vld [vmem:[%s311_s1 + $0x1] sm:$0x1]  ;;  %v33_v3 = vld [vmem:[%s311_s1 + $0x11] sm:$0x1]  ;;  %vm125_vm1 = vcmask 123904  }
  0x11   :  { %s143_s16 = sld [smem:[#allocation2 + $0x2]]  ;;  %v40_v5 = vld [vmem:[%s311_s1 + $0x2] sm:$0x1]  ;;  %v41_v6 = vld [vmem:[%s311_s1 + $0x12] sm:$0x1] }
  0x12   :  { %s144_s17 = sld [smem:[#allocation2 + $0x3]]  ;;  %v48_v10 = vld [vmem:[%s311_s1 + $0x3] sm:$0x1]  ;;  %v49_v11 = vld [vmem:[%s311_s1 + $0x13] sm:$0x1] }
  0x13   :  { %s217_s21 = sld [smem:[#allocation2 + $0x4]]  ;;  %v56_v18 = vld [vmem:[%s311_s1 + $0x4] sm:$0x1]  ;;  %v57_v19 = vld [vmem:[%s311_s1 + $0x14] sm:$0x1] }
  0x14   :  { %s225_s26 = sld [smem:[#allocation2 + $0x5]]  ;;  %v64_v25 = vld [vmem:[%s311_s1 + $0x5] sm:$0x1]  ;;  %v65_v26 = vld [vmem:[%s311_s1 + $0x15] sm:$0x1] }
  0x15   :  { %v28_v4 = vstv %s25_s14  ;;  %s233_s3 = sld [smem:[#allocation2 + $0x6]]  ;;  %v72_v32 = vld [vmem:[%s311_s1 + $0x6] sm:$0x1]  ;;  %v73_v33 = vld [vmem:[%s311_s1 + $0x16] sm:$0x1] }
  0x16   :  { %v29_v7 = vmul.f32 %v28_v4, %v26_v0  ;;  %v30_v8 = vmul.f32 %v28_v4, %v27_v1  ;;  %v34_v9 = vstv %s142_s15  ;;  %s241_s8 = sld [smem:[#allocation2 + $0x7]]  ;;  %v80_v39 = vld [vmem:[%s311_s1 + $0x7] sm:$0x1]  ;;  %v81_v40 = vld [vmem:[%s311_s1 + $0x17] sm:$0x1] }
  0x17   :  { %v35_v12 = vmul.f32 %v34_v9, %v32_v2  ;;  %v36_v13 = vmul.f32 %v34_v9, %v33_v3  ;;  %v42_v14 = vstv %s143_s16  ;;  %s249_s13 = sld [smem:[#allocation2 + $0x8]]  ;;  %v88_v46 = vld [vmem:[%s311_s1 + $0x8] sm:$0x1]  ;;  %v89_v47 = vld [vmem:[%s311_s1 + $0x18] sm:$0x1]  ;;  %s192_s16 = smov [#allocation5]  }
  0x18   :  { %v43_v15 = vmul.f32 %v42_v14, %v40_v5  ;;  %v44_v16 = vmul.f32 %v42_v14, %v41_v6  ;;  %v50_v17 = vstv %s144_s17  ;;  %s259_s18 = sld [smem:[#allocation2 + $0x9]]  ;;  %v96_v53 = vld [vmem:[%s311_s1 + $0x9] sm:$0x1]  ;;  %v97_v54 = vld [vmem:[%s311_s1 + $0x19] sm:$0x1]  ;;  %s133_s17 = sshll.u32 %s192_s16, 4  ;;  %s134_s17 = int_to_ptr.vmem [resolvable:$true] %s133_s17 }
  0x19   :  { %v37_v20 = vadd.f32 %v35_v12, %v29_v7  ;;  %v38_v21 = vadd.f32 %v36_v13, %v30_v8  ;;  %v51_v22 = vmul.f32 %v50_v17, %v48_v10  ;;  %v52_v23 = vmul.f32 %v50_v17, %v49_v11  ;;  %s268_s22 = sld [smem:[#allocation2 + $0xa]]  ;;  %v104_v60 = vld [vmem:[%s311_s1 + $0xa] sm:$0x1]  ;;  %v105_v61 = vld [vmem:[%s311_s1 + $0x1a] sm:$0x1]  ;;  %p172_p6 = scmp.lt.s32.totalorder %s134_s17, %s134_s17 }
  0x1a   :  { %v58_v24 = vstv %s217_s21  ;;  %v66_v27 = vstv %s225_s26  ;;  %s277_s27 = sld [smem:[#allocation2 + $0xb]]  ;;  %v112_v3 = vld [vmem:[%s311_s1 + $0xb] sm:$0x1]  ;;  %v113_v4 = vld [vmem:[%s311_s1 + $0x1b] sm:$0x1]  ;;  %s167_s1 = scalar_lea.vmem %s134_s17, 32 }
  0x1b   :  { %v45_v28 = vadd.f32 %v43_v15, %v37_v20  ;;  %v46_v29 = vadd.f32 %v44_v16, %v38_v21  ;;  %v59_v30 = vmul.f32 %v58_v24, %v56_v18  ;;  %v60_v31 = vmul.f32 %v58_v24, %v57_v19  ;;  %p168_p5 = scmp.ne.s32.totalorder %s134_s17, %s167_s1  ;;  %p173_p7 = scmp.lt.s32.totalorder %s167_s1, %s167_s1 }
  0x1c   :  { %v74_v34 = vstv %s233_s3  ;;  %v67_v37 = vmul.f32 %v66_v27, %v64_v25  ;;  %v68_v38 = vmul.f32 %v66_v27, %v65_v26  ;;  %v82_v41 = vstv %s241_s8 }
  0x1d   :  { %v53_v35 = vadd.f32 %v51_v22, %v45_v28  ;;  %v54_v36 = vadd.f32 %v52_v23, %v46_v29  ;;  %v75_v44 = vmul.f32 %v74_v34, %v72_v32  ;;  %v76_v45 = vmul.f32 %v74_v34, %v73_v33  ;;  %p174_p8 = por %p173_p7, %p172_p6 }
  0x1e   :  { %v90_v48 = vstv %s249_s13  ;;  %v83_v51 = vmul.f32 %v82_v41, %v80_v39  ;;  %v84_v52 = vmul.f32 %v82_v41, %v81_v40  ;;  %v98_v55 = vstv %s259_s18 }
  0x1f   :  { %v61_v42 = vadd.f32 %v59_v30, %v53_v35  ;;  %v62_v43 = vadd.f32 %v60_v31, %v54_v36  ;;  %v91_v58 = vmul.f32 %v90_v48, %v88_v46  ;;  %v92_v59 = vmul.f32 %v90_v48, %v89_v47  ;;  %p175_p9 = pnand %p174_p8, %p168_p5 }
  0x20   :  { %v106_v62 = vstv %s268_s22  ;;  %v99_v1 = vmul.f32 %v98_v55, %v96_v53  ;;  %v100_v2 = vmul.f32 %v98_v55, %v97_v54  ;;  %v114_v5 = vstv %s277_s27 }
  0x21   :  { %v69_v49 = vadd.f32 %v67_v37, %v61_v42  ;;  %v70_v50 = vadd.f32 %v68_v38, %v62_v43  ;;  %v107_v8 = vmul.f32 %v106_v62, %v104_v60  ;;  %v108_v9 = vmul.f32 %v106_v62, %v105_v61 }
  0x22   :  { %v115_v12 = vmul.f32 %v114_v5, %v112_v3  ;;  %v116_v13 = vmul.f32 %v114_v5, %v113_v4 }
  0x23   :  { %v77_v56 = vadd.f32 %v75_v44, %v69_v49  ;;  %v78_v57 = vadd.f32 %v76_v45, %v70_v50 }
  0x25   :  { %v85_v63 = vadd.f32 %v83_v51, %v77_v56  ;;  %v86_v0 = vadd.f32 %v84_v52, %v78_v57 }
  0x27   :  { %v93_v6 = vadd.f32 %v91_v58, %v85_v63  ;;  %v94_v7 = vadd.f32 %v92_v59, %v86_v0 }
  0x29   :  { %v101_v10 = vadd.f32 %v99_v1, %v93_v6  ;;  %v102_v11 = vadd.f32 %v100_v2, %v94_v7 }
  0x2b   :  { %v109_v14 = vadd.f32 %v107_v8, %v101_v10  ;;  %v110_v15 = vadd.f32 %v108_v9, %v102_v11 }
  0x2d   :  { %v117_v16 = vadd.f32 %v115_v12, %v109_v14  ;;  %v118_v17 = vadd.f32 %v116_v13, %v110_v15 }
  0x2f   :  { %v121_v18 = vrot.slane %v118_v17, 7 }
  0x31   :  { %v123_v19 = vsel %vm122_vm0, %v121_v18, %v117_v16 }
  0x32   :  { %126 = vst.msk [vmem:[#allocation5] sm:$0x3] %vm125_vm1, %v123_v19 }
  0x33   :  { %178 = shalt.err (!%p175_p9)
}
  0x34   :  { %136 = dma.vmem_to_hbm [thread:$0]  %s134_s17, 32, %s312_s2, [#allocation3]  }
  0x35   :  { %189 = dma.done.wait [#allocation3], 32  }
  0x36   :  { %190 = vsyncadd [#allocation3], 4294967264 }
  0x37   :  { %140 = vsyncpa [#allocation3], 1 }
  0x38   :  { %141 = vsyncpa [#allocation4], 1 }

</bundles_post_ra>
